<compile_context>
chip_gen: v7x
topology: tpu7x:2x2x1
jax: 0.10.0
libtpu: 0.0.40
codegen_flags: <defaults>
</compile_context>

<pallas_src>
import jax
import jax.numpy as jnp
from jax.experimental import pallas as pl
from jax.experimental.pallas import tpu as pltpu


def _wx_bias_kernel(w_ref, x_ref, b_ref, o_ref):
    # w_ref: (C_out, C_in)   x_ref: (C_in, t_hw)   b_ref: (C_out, 1) f32
    # out:   (C_out, t_hw)   -- lane-dense last dim, f32 MXU accumulation.
    acc = jnp.dot(w_ref[...], x_ref[...], preferred_element_type=jnp.float32)
    o_ref[...] = (acc + b_ref[...]).astype(o_ref.dtype)


def _round_up(v, m):
    return -(-v // m) * m


def _vmem_limit_bytes():
    # Per-generation scoped-VMEM limit: 3/4 of physical capacity, capped at
    # 96 MiB.  128 MiB parts (v5e/v6e) -> 96 MiB; 64 MiB/TC (v7x) -> 48 MiB.
    cap = 64 * 1024 * 1024  # conservative fallback (v7x per-TC)
    try:
        cap = int(pltpu.get_tpu_info().vmem_capacity_bytes)
    except Exception:
        pass
    return min(96 * 1024 * 1024, (cap * 3) // 4)


def _pick_hw_tile(hw, c_in, c_out, x_bytes, out_bytes, w_bytes, vmem_limit_bytes):
    """Largest lane-dense (multiple-of-128) spatial tile whose double-buffered
    in/out tiles plus the resident weight/bias fit ~85% of the VMEM limit."""
    hw_lanes = _round_up(hw, 128)
    usable = (vmem_limit_bytes * 85) // 100          # ~15% headroom
    ci8 = _round_up(c_in, 8)
    co8 = _round_up(c_out, 8)
    resident = (2 * co8 * _round_up(c_in, 128) * w_bytes   # weight, double-buffered
                + 2 * co8 * 128 * 4)                       # f32 bias, double-buffered
    for t in (32768, 16384, 8192, 4096, 2048, 1024, 512, 256, 128):
        if t > hw_lanes and t != 128:
            continue
        need = resident + 2 * t * (ci8 * x_bytes + co8 * out_bytes)
        if need <= usable:
            return t
    # TODO(synk): for very large channel counts add a C_out grid axis instead
    # of relying on the smallest spatial tile.
    return 128


def distributed_matmul_nchw(x, weight, bias, *, compute_dtype=None, out_dtype=None):
    """Forward of DistributedMatmul(input_format='nchw', bias=True), one device.

    x:      (N, C_in, H, W)
    weight: (C_out, C_in, 1, 1)   (conv2d 1x1 kernel)
    bias:   (1, C_out, 1, 1)
    compute_dtype: dtype of the streamed x / weight MXU operands. Default None
      = use x.dtype (recommended: feed bf16 activations to halve the HBM read
      stream; casting an f32 x here would cost an extra HBM pass, so it is
      only done when explicitly requested).  Accumulation + bias add are f32.
    out_dtype: output dtype; default x.dtype (use bf16 when downstream allows
      it to also halve the write stream).
    returns (N, C_out, H, W) in out_dtype.
    """
    N, C_in, H, W = x.shape
    C_out = weight.shape[0]
    HW = H * W
    out_dtype = x.dtype if out_dtype is None else out_dtype

    # Free reshapes only -- no extra HBM traffic.  Spatial becomes the
    # lane-dense last axis of both the streamed input and the output.
    x3 = x.reshape(N, C_in, HW)
    if compute_dtype is not None and x3.dtype != compute_dtype:
        # NOTE: out-of-kernel cast = one extra HBM pass over x; prefer feeding
        # x already in the desired stream dtype (AMP produces bf16 upstream).
        x3 = x3.astype(compute_dtype)
    w2 = weight.reshape(C_out, C_in).astype(x3.dtype)   # tiny; free to cast
    b2 = bias.reshape(C_out, 1).astype(jnp.float32)     # bias add stays f32

    x_bytes = x3.dtype.itemsize
    w_bytes = w2.dtype.itemsize
    o_bytes = jnp.dtype(out_dtype).itemsize

    vmem_limit = _vmem_limit_bytes()
    t_hw = _pick_hw_tile(HW, C_in, C_out, x_bytes, o_bytes, w_bytes, vmem_limit)

    # Keep enough grid steps to feed both v7x TensorCores (harmless on 1-TC
    # v5e/v6e: it only shrinks the tile when total work is already tiny).
    MIN_GRID_STEPS = 8
    while t_hw > 128 and N * (-(-HW // t_hw)) < MIN_GRID_STEPS:
        t_hw //= 2

    grid = (N, pl.cdiv(HW, t_hw))   # cdiv grid: masked tail block, no padding pass

    cost = pl.CostEstimate(
        flops=2 * N * C_out * C_in * HW,
        transcendentals=0,
        bytes_accessed=(N * C_in * HW * x_bytes
                        + N * C_out * HW * o_bytes
                        + C_out * C_in * w_bytes
                        + C_out * 4),
    )

    out3 = pl.pallas_call(
        _wx_bias_kernel,
        out_shape=jax.ShapeDtypeStruct((N, C_out, HW), out_dtype),
        grid=grid,
        in_specs=[
            # Full weight, resident across the grid (small at these channel
            # counts; add a C_out grid axis only for very large channels).
            pl.BlockSpec((C_out, C_in), lambda n, j: (0, 0)),
            # Streamed spatial tile of one batch element: kernel sees (C_in, t_hw).
            pl.BlockSpec((None, C_in, t_hw), lambda n, j: (n, 0, j)),
            # Bias column, resident.
            pl.BlockSpec((C_out, 1), lambda n, j: (0, 0)),
        ],
        out_specs=pl.BlockSpec((None, C_out, t_hw), lambda n, j: (n, 0, j)),
        compiler_params=pltpu.CompilerParams(
            dimension_semantics=("parallel", "parallel"),
            vmem_limit_bytes=vmem_limit,
        ),
        cost_estimate=cost,
    )(w2, x3, b2)

    # Free reshape back to NCHW.
    return out3.reshape(N, C_out, H, W)


if __name__ == "__main__":
    # Small, deterministic example consistent with the module's nchw path.
    N, C_in, C_out, H, W = 2, 16, 32, 16, 16

    key = jax.random.PRNGKey(0)
    kx, kw, kb = jax.random.split(key, 3)

    x = jax.random.normal(kx, (N, C_in, H, W), dtype=jnp.float32)
    # Parameter shapes from __init__ (nchw format, single-device shards):
    #   weight: (out_dim_local, inp_dim_local, 1, 1), bias: (1, out_dim_local, 1, 1)
    weight = jax.random.normal(kw, (C_out, C_in, 1, 1), dtype=jnp.float32) * 0.05
    bias = jax.random.normal(kb, (1, C_out, 1, 1), dtype=jnp.float32) * 0.1

    # TODO(synk): copy_to_parallel_region / reduce_from_parallel_region are
    # identity on a single device; the multi-device all-reduce over the 'fin'
    # comm axis is not modeled here.

    # Reference: 1x1 conv == einsum over channels, plus broadcast bias.
    ref = jnp.einsum("oc,nchw->nohw", weight.reshape(C_out, C_in), x) + bias

    # f32 path: tight check of kernel structure / indexing / tail handling.
    out_f32 = jax.block_until_ready(distributed_matmul_nchw(x, weight, bias))
    assert out_f32.shape == (N, C_out, H, W)
    assert jnp.allclose(out_f32, ref, atol=1e-4, rtol=1e-4), "f32 mismatch vs reference"

    # Recommended production path (AMP-style): bf16 activation stream + bf16
    # output -> ~2x less HBM traffic on this memory-bound op.
    out_bf16 = jax.block_until_ready(
        distributed_matmul_nchw(x.astype(jnp.bfloat16), weight, bias,
                                out_dtype=jnp.bfloat16))
    assert out_bf16.dtype == jnp.bfloat16
    assert jnp.allclose(out_bf16.astype(jnp.float32), ref, atol=5e-2, rtol=5e-2), \
        "bf16 mismatch vs reference"

    print("KERNEL_OK")
</pallas_src>

<mosaic_0001>
module attributes {stable_mosaic.version = 11 : i64} {
  func.func @_wx_bias_kernel(%arg0: i32, %arg1: i32, %arg2: memref<32x16xf32, #tpu.memory_space<vmem>>, %arg3: memref<1x16x128xf32, #tpu.memory_space<vmem>>, %arg4: memref<32x1xf32, #tpu.memory_space<vmem>>, %arg5: memref<1x32x128xf32, #tpu.memory_space<vmem>>) attributes {dimension_semantics = [#tpu.dimension_semantics<parallel>, #tpu.dimension_semantics<parallel>], iteration_bounds = array<i64: 2, 2>, scalar_prefetch = 0 : i64, scratch_operands = 0 : i64, tpu.core_type = #tpu.core_type<tc>, window_params = [{pipeline_mode = #tpu.pipeline_mode<synchronous>, transform_indices = @transform_0, window_bounds = array<i64: 32, 16>}, {transform_indices = @transform_1, window_bounds = array<i64: 1, 16, 128>}, {pipeline_mode = #tpu.pipeline_mode<synchronous>, transform_indices = @transform_2, window_bounds = array<i64: 32, 1>}, {transform_indices = @transform_3, window_bounds = array<i64: 1, 32, 128>}]} {
    %c0 = arith.constant 0 : index
    %c0_0 = arith.constant 0 : index
    %0 = vector.load %arg2[%c0, %c0_0] : memref<32x16xf32, #tpu.memory_space<vmem>>, vector<32x16xf32>
    %c0_1 = arith.constant 0 : index
    %c0_2 = arith.constant 0 : index
    %c0_3 = arith.constant 0 : index
    %1 = vector.load %arg3[%c0_1, %c0_2, %c0_3] : memref<1x16x128xf32, #tpu.memory_space<vmem>>, vector<1x16x128xf32>
    %2 = vector.shape_cast %1 : vector<1x16x128xf32> to vector<16x128xf32>
    %cst = arith.constant dense<0.000000e+00> : vector<32x128xf32>
    %3 = tpu.matmul %0, %2, %cst {dimension_numbers = #tpu.dot_dimension_numbers<[1], [0], [0], [1], [0, 0, 1, 1], [], []>} : vector<32x16xf32>, vector<16x128xf32>, vector<32x128xf32> -> vector<32x128xf32>
    %c0_4 = arith.constant 0 : index
    %c0_5 = arith.constant 0 : index
    %4 = vector.load %arg4[%c0_4, %c0_5] : memref<32x1xf32, #tpu.memory_space<vmem>>, vector<32x1xf32>
    %5 = vector.broadcast %4 : vector<32x1xf32> to vector<32x128xf32>
    %6 = arith.addf %3, %5 : vector<32x128xf32>
    %c0_6 = arith.constant 0 : index
    %c0_7 = arith.constant 0 : index
    %c0_8 = arith.constant 0 : index
    %7 = vector.load %arg5[%c0_6, %c0_7, %c0_8] : memref<1x32x128xf32, #tpu.memory_space<vmem>>, vector<1x32x128xf32>
    %8 = vector.shape_cast %7 : vector<1x32x128xf32> to vector<32x128xf32>
    %9 = vector.shape_cast %6 : vector<32x128xf32> to vector<1x32x128xf32>
    tpu.vector_store %arg5[%c0_6, %c0_7, %c0_8], %9 {strides = array<i32>} : memref<1x32x128xf32, #tpu.memory_space<vmem>>, vector<1x32x128xf32>,
    return
  }
  func.func @transform_0(%arg0: i32, %arg1: i32) -> (i32, i32) {
    %c0_i32 = arith.constant 0 : i32
    %c0_i32_0 = arith.constant 0 : i32
    %c0_i32_1 = arith.constant 0 : i32
    return %c0_i32, %c0_i32_0 : i32, i32
  }
  func.func @transform_1(%arg0: i32, %arg1: i32) -> (i32, i32, i32) {
    %c0_i32 = arith.constant 0 : i32
    %c0_i32_0 = arith.constant 0 : i32
    return %arg0, %c0_i32, %arg1 : i32, i32, i32
  }
  func.func @transform_2(%arg0: i32, %arg1: i32) -> (i32, i32) {
    %c0_i32 = arith.constant 0 : i32
    %c0_i32_0 = arith.constant 0 : i32
    %c0_i32_1 = arith.constant 0 : i32
    return %c0_i32, %c0_i32_0 : i32, i32
  }
  func.func @transform_3(%arg0: i32, %arg1: i32) -> (i32, i32, i32) {
    %c0_i32 = arith.constant 0 : i32
    %c0_i32_0 = arith.constant 0 : i32
    return %arg0, %c0_i32, %arg1 : i32, i32, i32
  }
}

</mosaic_0001>

<bundles_post_ra>
// kernel: tpu_custom_call.1
= control target key start
LH: loop header
LB: loop body
LE: loop exit
PB: predicated region body
PF: predicated region fallthrough
CT: control target
= control target key end

     0   :  { %8 = vsyncpa [#allocation4], 0  ;;  %s873_s0 = inlined_call_operand.vmem [shape: f32[32,16], index: 0, kind: input, shape index: {}]   ;;  %s874_s1 = inlined_call_operand.vmem [shape: f32[2,16,256], index: 1, kind: input, shape index: {}]   ;;  %s875_s2 = inlined_call_operand.vmem [shape: f32[32,1], index: 2, kind: input, shape index: {}]   ;;  %s876_s3 = inlined_call_operand.hbm [shape: f32[2,32,256], index: 3, kind: output, shape index: {}]  }
   0x1   :  { %10 = vsyncpa [#allocation4 + $0x1], 0  ;;  %s694_s12 = smov 0   ;;  %s696_s13 = smov 0  }
   0x2   :  { %s698_s14 = smov 0   ;;  %s700_s15 = smov 0  }
   0x3   :  { %s702_s16 = smov 0   ;;  %s704_s17 = smov 0  }
   0x4   :  { %s706_s18 = smov 0   ;;  %s708_s19 = smov 0  }
   0x5 LB: > { %s455_s20 = sadd.s32 4294967295, %s667_s19   ;;  %s456_s21 = sadd.s32 4294967294, %s667_s19   ;;  %s667_s19 = sphi %s708_s19, %s16_s19   ;;  %s663_s18 = sphi %s706_s18, %s886_s18   ;;  %s659_s17 = sphi %s704_s17, %s885_s17   ;;  %s655_s16 = sphi %s702_s16, %s884_s16   ;;  %s651_s15 = sphi %s700_s15, %s883_s15   ;;  %s647_s14 = sphi %s698_s14, %s882_s14   ;;  %s643_s13 = sphi %s696_s13, %s881_s13   ;;  %s639_s12 = sphi %s694_s12, %s880_s12  }
   0x6   : > { %s25_s22 = sadd.s32 1, %s659_s17  ;;  %s28_s23 = sadd.s32 1, %s663_s18 }
   0x7   : > { %p26_p0 = scmp.ge.s32.totalorder %s25_s22, 2  ;;  %p65_p1 = scmp.ne.s32.totalorder %s647_s14, %s643_s13 }
   0x8   : > { %p66_p2 = scmp.eq.s32.totalorder %s667_s19, 0  ;;  %p118_p5 = scmp.eq.s32.totalorder %s455_s20, 3 }
   0x9   : > { %s888_s22 = smov (%p26_p0, %s25_s22), 0  ;;  %s890_s23 = smov (!%p26_p0, %s28_s23), %s663_s18 }
   0xa   : > { %s54_s24 = ssub.s32 %s659_s17, %s888_s22  ;;  %p746_p3 = por %p66_p2, %p65_p1 }
   0xb   : > { %p30_p4 = scmp.ge.s32.totalorder %s890_s23, 2  ;;  %p123_p6 = scmp.ne.s32.totalorder %s643_s13, %s639_s12 }
   0xc   : > { %p124_p7 = scmp.eq.s32.totalorder %s456_s21, 3  ;;  %p754_p8 = por %p118_p5, %p65_p1 }
   0xd   : > { %s892_s23 = smov (%p30_p4, %s890_s23), 0  ;;  %s58_s30 = sadd.s32 1, %s647_s14 }
   0xe   : > { %p758_p9 = por %p124_p7, %p123_p6  ;;  %s53_s28 = ssub.s32 %s663_s18, %s892_s23 }
   0xf   : > { %s55_s29 = sor.u32 %s54_s24, %s53_s28  ;;  %p458_p11 = scmp.ge.s32.totalorder %s667_s19, 4 }
  0x10   : > { %p56_p10 = scmp.eq.s32.totalorder %s55_s29, 0 }
  0x11   : > { %146 = sbr.rel (%p458_p11) target bundleno = 31 (0x1f), region = 24 }
  0x12   : > { %s766_s4 = scalar_select %p56_p10, %s647_s14, %s58_s30  }
  0x18   : > { %149 = sbr.rel (!%p746_p3) target bundleno = 31 (0x1f), region = 28  ;;  %s151_s5 = sand.u32 (%p746_p3), 1, %s647_s14  }
  0x19   : > { %s460_s6 = sshll.u32 (%p746_p3), %s663_s18, 2  ;;  %s459_s7 = sshll.u32 (%p746_p3), %s151_s5, 4 }
  0x1a   : > { %s155_s8 = sadd.s32 (%p746_p3), %s659_s17, %s460_s6  ;;  %s153_s21 = scalar_lea.vmem (%p746_p3), [#allocation2], %s459_s7 }
  0x1b   : > { %s461_s9 = sshll.u32 (%p746_p3), %s155_s8, 3 }
  0x1c   : > { %s157_s20 = scalar_lea.vmem (%p746_p3), %s874_s1, %s461_s9 }
  0x1d   : > { %v187_v0 = vld [vmem:[%s157_s20] sm:$0xff] (%p746_p3)  ;;  %v189_v1 = vld [vmem:[%s157_s20 + $0x10] sm:$0xff] (%p746_p3) }
  0x1e   : > { %188 = vst [vmem:[%s153_s21] sm:$0xff] (%p746_p3), %v187_v0  ;;  %190 = vst [vmem:[%s153_s21 + $0x8] sm:$0xff] (%p746_p3), %v189_v1 }
  0x1f PF: > { %p462_p12 = scmp.ge.s32.totalorder %s667_s19, 1  ;;  %p195_p13 = scmp.lt.s32.totalorder %s667_s19, 5 }
  0x21   : > { %p196_p0 = pnand %p462_p12, %p195_p13 }
  0x22   : > { %s780_s24 = sand.u32 (!%p196_p0), 1, %s643_s13   ;;  %v225_v2 = vld [vmem:[%s873_s0] sm:$0xff] (!%p196_p0)  ;;  %vm255_vm0 = vcmask (!%p196_p0), 130048   ;;  %v227_v3 = vld [vmem:[%s873_s0 + $0x10] sm:$0xff] (!%p196_p0)  ;;  %v669_v6 = vmov (!%p196_p0), 0   ;;  %v234_v10 = vld [vmem:[%s875_s2 + $0x18] sm:$0xff] (!%p196_p0) }
  0x23   : > { %199 = sbr.rel (%p196_p0) target bundleno = 275 (0x113), region = 66  ;;  %s463_s5 = sshll.u32 (!%p196_p0), %s780_s24, 4  ;;  %484 = vmatprep.mubr.msk.f32.mxu0 (!%p196_p0), %vm255_vm0, %v225_v2  ;;  %487 = vmatprep.mubr.msk.f32.mxu1 (!%p196_p0), %vm255_vm0, %v227_v3  ;;  %v233_v4 = vld [vmem:[%s875_s2 + $0x10] sm:$0xff] (!%p196_p0)  ;;  %v231_v5 = vld [vmem:[%s875_s2] sm:$0xff] (!%p196_p0)  ;;  %v232_v11 = vld [vmem:[%s875_s2 + $0x8] sm:$0xff] (!%p196_p0) }
  0x24   : > { %572 = vset.pattern.permute.xlu1 (!%p196_p0), %v669_v6  ;;  %571 = vset.pattern.permute.xlu0 (!%p196_p0), %v669_v6  ;;  %s204_s10 = scalar_lea.vmem (!%p196_p0), [#allocation2], %s463_s5  ;;  %v226_v12 = vld [vmem:[%s873_s0 + $0x8] sm:$0xff] (!%p196_p0)  ;;  %v228_v13 = vld [vmem:[%s873_s0 + $0x18] sm:$0xff] (!%p196_p0)  ;;  %s464_s6 = sshll.u32 (!%p196_p0), %s780_s24, 5 }
  0x25   : > { %v229_v7 = vld [vmem:[%s204_s10] sm:$0xff] (!%p196_p0)  ;;  %v230_v8 = vld [vmem:[%s204_s10 + $0x8] sm:$0xff] (!%p196_p0)  ;;  %247 = vperm.xlu1 (!%p196_p0), %572, %v233_v4   ;;  %237 = vperm.xlu0 (!%p196_p0), %571, %v231_v5   ;;  %s470_s7 = sshll.u32 (!%p196_p0), %s655_s16, 3  ;;  %s224_s9 = scalar_lea.vmem (!%p196_p0), [#allocation3], %s464_s6 }
  0x26   : > { %v490_v9 = vpack.c.bf16 (!%p196_p0), %v230_v8, %v229_v7  ;;  %s369_s8 = sadd.s32 (!%p196_p0), %s651_s15, %s470_s7  ;;  %s372_s10 = sshll.u32 (!%p196_p0), %s224_s9, 4  ;;  %s814_s10 = int_to_ptr.vmem [resolvable:$true] %s372_s10 }
  0x27   : > { %s471_s11 = sshll.u32 (!%p196_p0), %s369_s8, 7  ;;  %s358_s21 = scalar_lea.sflag (!%p196_p0), [#allocation4], %s780_s24 }
  0x28   : > { %491 = vmatprep.subr.bf16.mxu0 (!%p196_p0), %v490_v9  ;;  %494 = vmatprep.subr.bf16.mxu1 (!%p196_p0), %v490_v9  ;;  %s819_s15 = scalar_lea.hbm (!%p196_p0), %s876_s3, %s471_s11  ;;  %s573_s25 = scalar_lea.vmem (!%p196_p0), %s814_s10, 512 }
  0x29   : > { %493 = vmatpush3.bf16.msra.mxu0 (!%p196_p0), %v490_v9  ;;  %495 = vmatpush3.bf16.msra.mxu1 (!%p196_p0), %v490_v9  ;;  %p574_p1 = scmp.ne.s32.totalorder (!%p196_p0), %s814_s10, %s573_s25  ;;  %s670_s28 = smov (!%p196_p0), [#allocation3]  }
  0x2a   : > { %252 = vperm.xlu1 %572, %v234_v10   ;;  %242 = vperm.xlu0 %571, %v232_v11   ;;  %s577_s29 = sshll.u32 %s670_s28, 4  ;;  %s578_s29 = int_to_ptr.vmem [resolvable:$false] %s577_s29 }
  0x2b   : > { %p575_p2 = pnand %p574_p1, %p754_p8  ;;  %s579_s30 = scalar_lea.vmem %s578_s29, 1024 }
  0x2c   : > { %485 = vmatmul.mubr.msk.f32.vlgmr.msra.gmra.mrb[0].mxu0 %vm255_vm0, %v226_v12  ;;  %488 = vmatmul.mubr.msk.f32.vlgmr.msra.gmra.mrb[0].mxu1 %vm255_vm0, %v228_v13  ;;  %p580_p4 = scmp.lt.s32.totalorder %s814_s10, %s578_s29  ;;  %p581_p5 = scmp.lt.s32.totalorder %s579_s30, %s573_s25 }
  0x2d   : > { %p576_p3 = pneg %p575_p2 }
  0x2e   : > { %p582_p6 = por %p581_p5, %p580_p4 }
  0x30   : > { %p583_p7 = pnand %p582_p6, %p576_p3 }
  0xa4   : > { %v248_v14 = vpop.permute.xlu1 %247  ;;  %v238_v15 = vpop.permute.xlu0 %237 }
  0xa9   : > { %v253_v16 = vpop.permute.xlu1 %252  ;;  %v243_v17 = vpop.permute.xlu0 %242 }
  0xff   : > { %v486_v18 = vpop.f32.mrb[0].mxu0  ;;  %v489_v19 = vpop.f32.mrb[0].mxu1 }
 0x100   : > { %v340_v20 = vadd.f32 %v486_v18, %v243_v17  ;;  %v350_v21 = vadd.f32 %v489_v19, %v253_v16  ;;  %v334_v22 = vpop.f32.mrb[1].mxu0  ;;  %v344_v23 = vpop.f32.mrb[1].mxu1 }
 0x101   : > { %v335_v24 = vadd.f32 %v334_v22, %v238_v15  ;;  %v345_v25 = vadd.f32 %v344_v23, %v248_v14 }
 0x102   : > { %354 = vst [vmem:[%s224_s9 + $0x8] sm:$0xff] %v340_v20  ;;  %356 = vst [vmem:[%s224_s9 + $0x18] sm:$0xff] %v350_v21 }
 0x103   : > { %353 = vst [vmem:[%s224_s9] sm:$0xff] %v335_v24  ;;  %355 = vst [vmem:[%s224_s9 + $0x10] sm:$0xff] %v345_v25 }
 0x104   : > { %586 = shalt.err (!%p583_p7)
}
 0x105   : > { %s587_s5 = scalar_lea.hbm %s819_s15, 512  ;;  %s591_s8 = scalar_lea.hbm %s876_s3, 2048 }
 0x106   : > { %p588_p10 = scmp.ne.s32.totalorder %s819_s15, %s587_s5  ;;  %p592_p13 = scmp.lt.u32.totalorder %s819_s15, %s876_s3 }
 0x107   : > { %p593_p0 = scmp.lt.u32.totalorder %s591_s8, %s587_s5  ;;  %p595_p2 = scmp.lt.u32.totalorder %s587_s5, %s819_s15 }
 0x108   : > { %p589_p11 = pnand %p588_p10, %p754_p8 }
 0x109   : > { %p594_p1 = por %p593_p0, %p592_p13 }
 0x10a   : > { %p590_p12 = pneg %p589_p11 }
 0x10b   : > { %p596_p3 = por %p595_p2, %p594_p1 }
 0x10d   : > { %p597_p4 = pnand %p596_p3, %p590_p12 }
 0x10f   : > { %600 = shalt.err (!%p597_p4)
}
 0x110   : > { %s671_s16 = smov 128   ;;  %s672_s20 = smov 256  }
 0x111   : > { %s673_s25 = smov 8  }
 0x112   : > { %496 = dma.vmem_to_hbm [thread:$0]  (%p754_p8), %s814_s10, 512, %s819_s15, %s358_s21, %s671_s16, %s672_s20, %s673_s25  }
 0x113 PF: > { %p502_p5 = scmp.ge.s32.totalorder %s667_s19, 2  ;;  %s387_s28 = sand.u32 1, %s639_s12  }
 0x114   : > { %s388_s29 = scalar_lea.sflag [#allocation4], %s387_s28 }
 0x115   : > { %p499_p6 = pnand %p502_p5, %p758_p9 }
 0x117   : > { %634 = dma.done.wait (!%p499_p6), %s388_s29, 512  }
 0x118   : > { %636 = vsyncadd (!%p499_p6), %s388_s29, 4294966784  ;;  %s16_s19 = sadd.s32 1, %s667_s19   ;;  %s880_s12 = smov %s643_s13 }
 0x119   : > { %p13_p7 = scmp.ge.s32.totalorder %s16_s19, 6   ;;  %s881_s13 = smov %s647_s14 }
 0x11a   : > { %s882_s14 = smov %s766_s4  ;;  %s883_s15 = smov %s659_s17 }
 0x11b   : > { %s884_s16 = smov %s663_s18  ;;  %s885_s17 = smov %s888_s22 }
 0x11c   : > { %s886_s18 = smov %s892_s23  ;;  %15 = sbr.rel (!%p13_p7) target bundleno = 5 (0x5), region = 110 }
 0x123   :  { %393 = vsyncpa [#allocation4], 1 }
 0x124   :  { %395 = vsyncpa [#allocation4 + $0x1], 1 }

</bundles_post_ra>
